<compile_context>
chip_gen: v7x
topology: tpu7x:2x2x1
jax: 0.10.0
libtpu: 0.0.40
codegen_flags: <defaults>
</compile_context>

<pallas_src>
import math

import jax
import jax.numpy as jnp
from jax.experimental import pallas as pl
from jax.experimental.pallas import tpu as pltpu

LANE = 128
BLOCK_BYTES = 2 << 20   # ~2 MiB per pipeline buffer (near the HBM-roofline knee)
MIN_TM = 256            # minimum rows per block (128 KiB f32) so steps stay cheap
TARGET_STEPS = 8        # aim for >= 8 grid steps so pipelining / both v7x TCs engage


def _round_up(a: int, b: int) -> int:
    return -(-a // b) * b


def _sine_kernel(omega_ref, x_ref, o_ref):
    # omega_ref: (1,) f32 in SMEM (runtime scalar -> one compile for all omega values).
    # x_ref / o_ref: (tm, 128) VMEM tiles. Compute in f32, cast on store.
    omega = omega_ref[0]
    x = x_ref[...].astype(jnp.float32)
    o_ref[...] = jnp.sin(omega * x).astype(o_ref.dtype)


def _sine_2d(x2d: jax.Array, omega_arr: jax.Array, *, inplace: bool) -> jax.Array:
    rows = x2d.shape[0]
    itemsize = jnp.dtype(x2d.dtype).itemsize

    # Bytes-matched tile: ~2 MiB/block regardless of dtype (4096 rows f32, 8192 bf16).
    max_tm = max(MIN_TM, BLOCK_BYTES // (LANE * itemsize))
    # ~TARGET_STEPS grid steps when the array allows; multiple of 32 rows for layout.
    tm = min(max_tm, max(MIN_TM, _round_up(pl.cdiv(rows, TARGET_STEPS), 32)))
    if tm >= rows:
        tm = rows  # single block == full array (always layout-legal)
    grid = (pl.cdiv(rows, tm),)

    return pl.pallas_call(
        _sine_kernel,
        out_shape=jax.ShapeDtypeStruct((rows, LANE), x2d.dtype),
        grid=grid,
        in_specs=[
            pl.BlockSpec(memory_space=pltpu.MemorySpace.SMEM),   # omega scalar
            pl.BlockSpec((tm, LANE), lambda i: (i, 0)),          # input tile
        ],
        out_specs=pl.BlockSpec((tm, LANE), lambda i: (i, 0)),
        compiler_params=pltpu.CompilerParams(
            dimension_semantics=("parallel",),
        ),
        input_output_aliases=({1: 0} if inplace else {}),
    )(omega_arr, x2d)


def sine(x: jax.Array, omega: float = math.pi, inplace: bool = False) -> jax.Array:
    """Applies Sine(z) = sin(omega * z) elementwise via a Pallas TPU kernel."""
    orig_shape = x.shape
    orig_dtype = x.dtype
    n = x.size

    rem = n % LANE
    n_aligned = n - rem

    # Empty or tiny (<128 element) inputs: a kernel launch is not worth it.
    if n_aligned == 0:
        return jnp.sin(jnp.float32(omega) * x.astype(jnp.float32)).astype(orig_dtype)

    omega_arr = jnp.full((1,), omega, dtype=jnp.float32)

    flat = x.reshape(-1)
    head = flat if rem == 0 else flat[:n_aligned]     # 128-aligned prefix
    rows = n_aligned // LANE

    out2d = _sine_2d(head.reshape(rows, LANE), omega_arr, inplace=inplace)
    out_flat = out2d.reshape(-1)

    if rem != 0:
        # <128-element tail: plain jnp.sin, then append (no full-array pad/slice copies).
        tail = flat[n_aligned:]
        tail_out = jnp.sin(jnp.float32(omega) * tail.astype(jnp.float32)).astype(orig_dtype)
        out_flat = jnp.concatenate([out_flat, tail_out])

    return out_flat.reshape(orig_shape)


if __name__ == "__main__":
    key = jax.random.PRNGKey(0)
    # NCHW-style input consistent with typical conv activations.
    x = jax.random.normal(key, (2, 4, 16, 16), dtype=jnp.float32)

    y = sine(x)  # default omega = pi, matching the PyTorch module
    jax.block_until_ready(y)

    ref = jnp.sin(math.pi * x)
    assert y.shape == x.shape and y.dtype == x.dtype
    assert jnp.allclose(y, ref, atol=1e-5, rtol=1e-5)

    # Ragged path (numel % 128 != 0) + a different omega (same compiled kernel: SMEM scalar).
    x2 = jax.random.normal(jax.random.PRNGKey(1), (5, 131), dtype=jnp.float32)
    y2 = sine(x2, omega=2.0)
    jax.block_until_ready(y2)
    ref2 = jnp.sin(2.0 * x2)
    assert y2.shape == x2.shape and y2.dtype == x2.dtype
    assert jnp.allclose(y2, ref2, atol=1e-5, rtol=1e-5)

    # bf16 path (tile sizing scales with dtype to keep ~2 MiB per block).
    x3 = jax.random.normal(jax.random.PRNGKey(2), (2, 8, 64), dtype=jnp.bfloat16)
    y3 = sine(x3)
    jax.block_until_ready(y3)
    ref3 = jnp.sin(math.pi * x3.astype(jnp.float32)).astype(jnp.bfloat16)
    assert y3.shape == x3.shape and y3.dtype == x3.dtype
    assert jnp.allclose(y3.astype(jnp.float32), ref3.astype(jnp.float32),
                        atol=2e-2, rtol=2e-2)

    print("KERNEL_OK")
</pallas_src>

<mosaic_0001>
module attributes {stable_mosaic.version = 11 : i64} {
  func.func @_sine_kernel(%arg0: i32, %arg1: memref<1xf32, #tpu.memory_space<smem>>, %arg2: memref<16x128xf32, #tpu.memory_space<vmem>>, %arg3: memref<16x128xf32, #tpu.memory_space<vmem>>) attributes {dimension_semantics = [#tpu.dimension_semantics<parallel>], iteration_bounds = array<i64: 1>, scalar_prefetch = 0 : i64, scratch_operands = 0 : i64, tpu.core_type = #tpu.core_type<tc>, window_params = [{transform_indices = @transform_0, window_bounds = array<i64: 1>}, {transform_indices = @transform_1, window_bounds = array<i64: 16, 128>}, {transform_indices = @transform_2, window_bounds = array<i64: 16, 128>}]} {
    %c0 = arith.constant 0 : index
    %0 = memref.load %arg1[%c0] : memref<1xf32, #tpu.memory_space<smem>>
    %c0_0 = arith.constant 0 : index
    %c0_1 = arith.constant 0 : index
    %1 = vector.load %arg2[%c0_0, %c0_1] : memref<16x128xf32, #tpu.memory_space<vmem>>, vector<16x128xf32>
    %2 = vector.broadcast %0 : f32 to vector<16x128xf32>
    %3 = arith.mulf %2, %1 : vector<16x128xf32>
    %4 = math.sin %3 : vector<16x128xf32>
    %c0_2 = arith.constant 0 : index
    %c0_3 = arith.constant 0 : index
    %5 = vector.load %arg3[%c0_2, %c0_3] : memref<16x128xf32, #tpu.memory_space<vmem>>, vector<16x128xf32>
    tpu.vector_store %arg3[%c0_2, %c0_3], %4 {strides = array<i32>} : memref<16x128xf32, #tpu.memory_space<vmem>>, vector<16x128xf32>,
    return
  }
  func.func @transform_0(%arg0: i32) -> i32 {
    %c0_i32 = arith.constant 0 : i32
    %c0_i32_0 = arith.constant 0 : i32
    return %c0_i32 : i32
  }
  func.func @transform_1(%arg0: i32) -> (i32, i32) {
    %c0_i32 = arith.constant 0 : i32
    %c0_i32_0 = arith.constant 0 : i32
    return %arg0, %c0_i32 : i32, i32
  }
  func.func @transform_2(%arg0: i32) -> (i32, i32) {
    %c0_i32 = arith.constant 0 : i32
    %c0_i32_0 = arith.constant 0 : i32
    return %arg0, %c0_i32 : i32, i32
  }
}

</mosaic_0001>

<bundles_post_ra>
// kernel: tpu_custom_call.1
= control target key start
LH: loop header
LB: loop body
LE: loop exit
PB: predicated region body
PF: predicated region fallthrough
CT: control target
= control target key end

     0   :  { %8 = vsyncpa [#allocation4], 0  ;;  %s470_s0 = inlined_call_operand.<no memory space> [shape: f32[1], index: 0, kind: input, shape index: {}]   ;;  %s471_s1 = inlined_call_operand.hbm [shape: f32[16,128], index: 1, kind: input, shape index: {}]   ;;  %s472_s2 = inlined_call_operand.hbm [shape: f32[16,128], index: 2, kind: output, shape index: {}]  }
   0x1   :  { %9 = vsyncpa [#allocation5], 0  ;;  %s342_s9 = smov [#allocation3]   ;;  %s294_s13 = scalar_lea.hbm %s471_s1, 256 }
   0x2   :  { %s17_s10 = sshll.u32 %s342_s9, 4  ;;  %p295_p0 = scmp.ne.s32.totalorder %s471_s1, %s294_s13  ;;  %s18_s10 = int_to_ptr.vmem [resolvable:$true] %s17_s10 }
   0x3   :  { %p298_p1 = scmp.lt.u32.totalorder %s294_s13, %s471_s1 }
   0x5   :  { %p300_p2 = pnand %p298_p1, %p295_p0 }
   0x7   :  { %303 = shalt.err (!%p300_p2)
}
   0x8   :  { %s304_s18 = scalar_lea.vmem %s18_s10, 256  ;;  %p309_p4 = scmp.lt.s32.totalorder %s18_s10, %s18_s10 }
   0x9   :  { %p305_p3 = scmp.ne.s32.totalorder %s18_s10, %s304_s18  ;;  %p310_p5 = scmp.lt.s32.totalorder %s304_s18, %s304_s18 }
   0xb   :  { %p311_p6 = por %p310_p5, %p309_p4 }
   0xd   :  { %p312_p7 = pnand %p311_p6, %p305_p3 }
   0xf   :  { %315 = shalt.err (!%p312_p7)
}
  0x10   :  { %s343_s19 = smov 128   ;;  %s344_s20 = smov 8  }
  0x11   :  { %23 = dma.hbm_to_vmem [thread:$0]  %s471_s1, 256, %s18_s10, [#allocation4], %s343_s19, %s343_s19, %s344_s20  }
  0x12   :  { %338 = dma.done.wait [#allocation4], 256  }
  0x13   :  { %339 = vsyncadd [#allocation4], 4294967040  ;;  %v30_v0 = vstv %s470_s0  ;;  %v28_v1 = vld [vmem:[#allocation3] sm:$0xff]  ;;  %v29_v2 = vld [vmem:[#allocation3 + $0x8] sm:$0xff]  ;;  %v345_v27 = vmov 683565275  }
  0x14   :  { %v385_v3 = vmul.f32 %v30_v0, %v28_v1  ;;  %v387_v4 = vmul.f32 %v30_v0, %v29_v2  ;;  %v346_v29 = vmov 2475754826   ;;  %v347_v31 = vmov 2131351028   ;;  %s351_s0 = smov [#allocation6]  }
  0x15   :  { %v348_v33 = vmov 2102212464   ;;  %v349_v35 = vmov 920167782   ;;  %v350_v43 = vmov 1326507024  }
  0x16   :  { %v33_v5 = vand.u32 2147483647, %v385_v3  ;;  %v36_v6 = vand.u32 2139095040, %v385_v3  ;;  %v137_v7 = vand.u32 2147483647, %v387_v4  ;;  %v140_v8 = vand.u32 2139095040, %v387_v4 }
  0x17   :  { %vm35_vm14 = vcmp.lt.s32.totalorder %v385_v3, 0  ;;  %s248_s1 = sshll.u32 %s351_s0, 4  ;;  %s249_s1 = int_to_ptr.vmem [resolvable:$true] %s248_s1 }
  0x18   :  { %v37_v9 = vshrl.u32 %v36_v6, 23  ;;  %v40_v10 = vand.u32 8388607, %v33_v5  ;;  %v141_v11 = vshrl.u32 %v140_v8, 23  ;;  %v144_v12 = vand.u32 8388607, %v137_v7  ;;  %p321_p9 = scmp.lt.s32.totalorder %s249_s1, %s249_s1 }
  0x19   :  { %vm34_vm15 = vcmp.le.f32.partialorder %v33_v5, 0.7853982  ;;  %s316_s25 = scalar_lea.vmem %s249_s1, 256 }
  0x1a   :  { %v260_v13 = vadd.s32 4294967169, %v37_v9  ;;  %v264_v14 = vadd.s32 4294967169, %v141_v11  ;;  %v41_v16 = vor.u32 8388608, %v40_v10  ;;  %v145_v17 = vor.u32 8388608, %v144_v12  ;;  %p317_p8 = scmp.ne.s32.totalorder %s249_s1, %s316_s25  ;;  %p322_p10 = scmp.lt.s32.totalorder %s316_s25, %s316_s25 }
  0x1c   :  { %v43_v15 = vadd.s32 1, %v260_v13  ;;  %v147_v18 = vadd.s32 1, %v264_v14  ;;  %v397_v23 = vshll.u32 %v41_v16, 8  ;;  %v399_v25 = vshll.u32 %v145_v17, 8  ;;  %p323_p11 = por %p322_p10, %p321_p9 }
  0x1e   :  { %vm44_vm0 = vcmp.gt.s32.totalorder %v43_v15, 0  ;;  %vm148_vm1 = vcmp.gt.s32.totalorder %v147_v18, 0  ;;  %p324_p12 = pnand %p323_p11, %p317_p8 }
  0x1f   :  { %v45_v19 = vsel %vm44_vm0, %v43_v15, 0  ;;  %v149_v22 = vsel %vm148_vm1, %v147_v18, 0  ;;  %vm139_vm0 = vcmp.lt.s32.totalorder %v387_v4, 0  ;;  %vm138_vm1 = vcmp.le.f32.partialorder %v137_v7, 0.7853982 }
  0x20   :  { %v46_v20 = vshrl.u32 %v45_v19, 5  ;;  %v47_v21 = vand.u32 31, %v45_v19  ;;  %v151_v24 = vand.u32 31, %v149_v22  ;;  %v401_v37 = vshrl.u32 %v149_v22, 5 }
  0x22   :  { %v48_v26 = vsub.s32 32, %v47_v21  ;;  %v50_v28 = vshll.u32 %v345_v27, %v47_v21  ;;  %v53_v30 = vshll.u32 %v346_v29, %v47_v21  ;;  %v56_v32 = vshll.u32 %v347_v31, %v47_v21 }
  0x23   :  { %v59_v34 = vshll.u32 %v348_v33, %v47_v21  ;;  %v62_v36 = vshll.u32 %v349_v35, %v47_v21  ;;  %vm65_vm2 = vcmp.lt.s32.totalorder %v46_v20, 1  ;;  %vm66_vm3 = vcmp.lt.s32.totalorder %v46_v20, 2 }
  0x24   :  { %v49_v38 = vshrl.u32 %v345_v27, %v48_v26  ;;  %v51_v39 = vshrl.u32 %v346_v29, %v48_v26  ;;  %v54_v40 = vshrl.u32 %v347_v31, %v48_v26  ;;  %v57_v41 = vshrl.u32 %v348_v33, %v48_v26 }
  0x25   :  { %v60_v42 = vshrl.u32 %v349_v35, %v48_v26  ;;  %v63_v44 = vshrl.u32 %v350_v43, %v48_v26  ;;  %vm68_vm4 = vcmp.lt.s32.totalorder %v46_v20, 4  ;;  %v152_v48 = vsub.s32 32, %v151_v24 }
  0x26   :  { %v52_v45 = vor.u32 %v51_v39, %v50_v28  ;;  %v55_v46 = vor.u32 %v54_v40, %v53_v30  ;;  %v58_v47 = vor.u32 %v57_v41, %v56_v32  ;;  %vm67_vm5 = vcmp.lt.s32.totalorder %v46_v20, 3 }
  0x27   :  { %v61_v49 = vor.u32 %v60_v42, %v59_v34  ;;  %v64_v50 = vor.u32 %v63_v44, %v62_v36  ;;  %v154_v51 = vshll.u32 %v345_v27, %v151_v24  ;;  %v157_v59 = vshll.u32 %v346_v29, %v151_v24 }
  0x28   :  { %v69_v52 = vsel %vm65_vm2, %v49_v38, %v52_v45  ;;  %v70_v53 = vsel %vm68_vm4, %v58_v47, 2102212464  ;;  %v73_v54 = vsel %vm65_vm2, %v52_v45, %v55_v46  ;;  %v77_v55 = vsel %vm65_vm2, %v55_v46, %v58_v47 }
  0x29   :  { %v71_v56 = vsel %vm67_vm5, %v55_v46, %v70_v53  ;;  %v74_v57 = vsel %vm68_vm4, %v61_v49, 920167782  ;;  %v78_v58 = vsel %vm68_vm4, %v64_v50, 1326507024  ;;  %v153_v62 = vshrl.u32 %v345_v27, %v152_v48 }
  0x2a   :  { %v75_v60 = vsel %vm67_vm5, %v58_v47, %v74_v57  ;;  %v79_v61 = vsel %vm67_vm5, %v61_v49, %v78_v58  ;;  %v155_v63 = vshrl.u32 %v346_v29, %v152_v48  ;;  %v72_v0 = vsel %vm66_vm3, %v69_v52, %v71_v56 }
  0x2b   :  { %v76_v1 = vsel %vm66_vm3, %v73_v54, %v75_v60  ;;  %v80_v2 = vsel %vm66_vm3, %v77_v55, %v79_v61  ;;  %v158_v6 = vshrl.u32 %v347_v31, %v152_v48  ;;  %v160_v14 = vshll.u32 %v347_v31, %v151_v24 }
  0x2c   :  { %v410_v8 = vmul.u32.u64.low %v397_v23, %v80_v2  ;;  %v411_v9 = vmul.u32.u64.high %v397_v23, %v80_v2, %v410_v8  ;;  %v414_v10 = vmul.u32.u64.low %v397_v23, %v76_v1  ;;  %v415_v11 = vmul.u32.u64.high %v397_v23, %v76_v1, %v414_v10 }
  0x2d   :  { %v156_v12 = vor.u32 %v155_v63, %v154_v51  ;;  %v159_v13 = vor.u32 %v158_v6, %v157_v59  ;;  %v161_v15 = vshrl.u32 %v348_v33, %v152_v48  ;;  %v163_v16 = vshll.u32 %v348_v33, %v151_v24 }
  0x2e   :  { %v164_v17 = vshrl.u32 %v349_v35, %v152_v48  ;;  %v166_v18 = vshll.u32 %v349_v35, %v151_v24  ;;  %v167_v19 = vshrl.u32 %v350_v43, %v152_v48  ;;  %v88_v20 = vmul.u32 %v397_v23, %v72_v0 }
  0x2f   :  { %v162_v21 = vor.u32 %v161_v15, %v160_v14  ;;  %vm169_vm6 = vcmp.lt.s32.totalorder %v401_v37, 1  ;;  %vm170_vm7 = vcmp.lt.s32.totalorder %v401_v37, 2  ;;  %vm90_vm8 = vc.u32 %v411_v9, %v414_v10 }
  0x30   :  { %v91_v22 = vadd.s32 1, %v415_v11  ;;  %v165_v26 = vor.u32 %v164_v17, %v163_v16  ;;  %vm171_vm9 = vcmp.lt.s32.totalorder %v401_v37, 3  ;;  %v168_v27 = vor.u32 %v167_v19, %v166_v18 }
  0x31   :  { %vm172_vm10 = vcmp.lt.s32.totalorder %v401_v37, 4  ;;  %v173_v28 = vsel %vm169_vm6, %v153_v62, %v156_v12  ;;  %v177_v24 = vsel %vm169_vm6, %v156_v12, %v159_v13  ;;  %v181_v31 = vsel %vm169_vm6, %v159_v13, %v162_v21 }
  0x32   :  { %v92_v29 = vsel %vm90_vm8, %v91_v22, %v415_v11  ;;  %v174_v23 = vsel %vm172_vm10, %v162_v21, 2102212464  ;;  %v178_v30 = vsel %vm172_vm10, %v165_v26, 920167782  ;;  %v182_v35 = vsel %vm172_vm10, %v168_v27, 1326507024 }
  0x33   :  { %v93_v32 = vadd.s32 %v92_v29, %v88_v20  ;;  %v175_v33 = vsel %vm171_vm9, %v159_v13, %v174_v23  ;;  %v179_v34 = vsel %vm171_vm9, %v162_v21, %v178_v30  ;;  %v183_v39 = vsel %vm171_vm9, %v165_v26, %v182_v35 }
  0x34   :  { %v176_v36 = vsel %vm170_vm7, %v173_v28, %v175_v33  ;;  %v180_v38 = vsel %vm170_vm7, %v177_v24, %v179_v34  ;;  %v184_v41 = vsel %vm170_vm7, %v181_v31, %v183_v39  ;;  %v89_v60 = vadd.s32 %v414_v10, %v411_v9 }
  0x35   :  { %v94_v40 = vadd.s32 536870912, %v93_v32  ;;  %v432_v42 = vmul.u32.u64.low %v399_v25, %v180_v38  ;;  %v433_v43 = vmul.u32.u64.high %v399_v25, %v180_v38, %v432_v42  ;;  %v192_v47 = vmul.u32 %v399_v25, %v176_v36 }
  0x36   :  { %v436_v44 = vmul.u32.u64.low %v399_v25, %v184_v41  ;;  %v437_v45 = vmul.u32.u64.high %v399_v25, %v184_v41, %v436_v44  ;;  %vm125_vm5 = vweird.f32 %v385_v3  ;;  %vm229_vm9 = vweird.f32 %v387_v4 }
  0x37   :  { %v95_v46 = vshrl.u32 %v94_v40, 30  ;;  %v195_v49 = vadd.s32 1, %v433_v43 }
  0x38   :  { %vm194_vm11 = vc.u32 %v437_v45, %v432_v42  ;;  %v193_v16 = vadd.s32 %v432_v42, %v437_v45 }
  0x39   :  { %v96_v48 = vshll.u32 %v95_v46, 30  ;;  %v196_v37 = vsel %vm194_vm11, %v195_v49, %v433_v43  ;;  %v119_v9 = vsub.s32 4, %v95_v46 }
  0x3a   :  { %v197_v51 = vadd.s32 %v196_v37, %v192_v47 }
  0x3b   :  { %v97_v50 = vsub.s32 %v93_v32, %v96_v48  ;;  %v120_v28 = vsel %vm35_vm14, %v119_v9, %v95_v46 }
  0x3c   :  { %v198_v53 = vadd.s32 536870912, %v197_v51  ;;  %v122_v31 = vsel %vm34_vm15, 0, %v120_v28 }
  0x3d   :  { %v99_v52 = vsub.s32 0, %v97_v50  ;;  %v126_v36 = vadd.s32 3, %v122_v31 }
  0x3e   :  { %v199_v55 = vshrl.u32 %v198_v53, 30 }
  0x3f   :  { %v261_v54 = vmin.u32 %v99_v52, %v97_v50  ;;  %v127_v40 = vand.u32 3, %v126_v36 }
  0x40   :  { %v200_v57 = vshll.u32 %v199_v55, 30  ;;  %v223_v35 = vsub.s32 4, %v199_v55 }
  0x41   :  { %v101_v56 = vclz %v261_v54  ;;  %vm132_vm2 = vcmp.eq.s32.totalorder %v127_v40, 2  ;;  %vm129_vm3 = vcmp.eq.s32.totalorder %v127_v40, 0  ;;  %vm128_vm4 = vcmp.lt.s32.totalorder %v127_v40, 2 }
  0x42   :  { %v201_v59 = vsub.s32 %v197_v51, %v200_v57  ;;  %v224_v39 = vsel %vm139_vm0, %v223_v35, %v199_v55 }
  0x43   :  { %v262_v58 = vadd.s32 4294967294, %v101_v56  ;;  %v226_v43 = vsel %vm138_vm1, 0, %v224_v39 }
  0x44   :  { %v203_v61 = vsub.s32 0, %v201_v59  ;;  %v230_v47 = vadd.s32 3, %v226_v43 }
  0x45   :  { %vm263_vm12 = vcmp.lt.s32.totalorder %v262_v58, 0 }
  0x46   :  { %v104_v25 = vsel %vm263_vm12, 0, %v262_v58  ;;  %v265_v1 = vmin.u32 %v203_v61, %v201_v59  ;;  %v231_v37 = vand.u32 3, %v230_v47 }
  0x47   :  { %v105_v62 = vsub.s32 32, %v104_v25  ;;  %v106_v63 = vshll.u32 %v97_v50, %v104_v25  ;;  %v109_v0 = vsub.s32 4294967266, %v104_v25 }
  0x48   :  { %v205_v8 = vclz %v265_v1  ;;  %vm236_vm6 = vcmp.eq.s32.totalorder %v231_v37, 2  ;;  %vm233_vm7 = vcmp.eq.s32.totalorder %v231_v37, 0  ;;  %vm232_vm8 = vcmp.lt.s32.totalorder %v231_v37, 2 }
  0x49   :  { %v107_v2 = vshrl.u32 %v89_v60, %v105_v62  ;;  %v110_v6 = vadd.s32 127, %v109_v0 }
  0x4a   :  { %v266_v13 = vadd.s32 4294967294, %v205_v8 }
  0x4b   :  { %v108_v11 = vor.u32 %v107_v2, %v106_v63  ;;  %v111_v12 = vshll.u32 %v110_v6, 23 }
  0x4c   :  { %vm267_vm13 = vcmp.lt.s32.totalorder %v266_v13, 0 }
  0x4d   :  { %v112_v14 = vor.u32 4788187, %v111_v12  ;;  %v115_v15 = vcvt.s32.f32 %v108_v11  ;;  %v208_v10 = vsel %vm267_vm13, 0, %v266_v13 }
  0x4e   :  { %v209_v18 = vsub.s32 32, %v208_v10  ;;  %v210_v19 = vshll.u32 %v201_v59, %v208_v10  ;;  %v213_v20 = vsub.s32 4294967266, %v208_v10 }
  0x4f   :  { %v113_v17 = vand.u32 2147483647, %v112_v14 }
  0x50   :  { %v211_v22 = vshrl.u32 %v193_v16, %v209_v18  ;;  %v214_v26 = vadd.s32 127, %v213_v20 }
  0x51   :  { %v116_v21 = vmul.f32 %v115_v15, %v113_v17 }
  0x52   :  { %v212_v24 = vor.u32 %v211_v22, %v210_v19  ;;  %v215_v29 = vshll.u32 %v214_v26, 23 }
  0x53   :  { %v117_v27 = vxor.u32 2147483648, %v116_v21 }
  0x54   :  { %v216_v32 = vor.u32 4788187, %v215_v29  ;;  %v219_v33 = vcvt.s32.f32 %v212_v24 }
  0x55   :  { %v118_v23 = vsel %vm35_vm14, %v117_v27, %v116_v21 }
  0x56   :  { %v121_v30 = vsel %vm34_vm15, %v385_v3, %v118_v23  ;;  %v217_v34 = vand.u32 2147483647, %v216_v32 }
  0x57   :  { %286 = vcosq.f32 %v121_v30 }
  0x58   :  { %288 = vsinq.f32 %v121_v30  ;;  %v220_v38 = vmul.f32 %v219_v33, %v217_v34 }
  0x5a   :  { %v221_v5 = vxor.u32 2147483648, %v220_v38 }
  0x5c   :  { %v222_v41 = vsel %vm139_vm0, %v221_v5, %v220_v38 }
  0x5d   :  { %v225_v42 = vsel %vm138_vm1, %v387_v4, %v222_v41 }
  0x5e   :  { %290 = vcosq.f32 %v225_v42 }
  0x5f   :  { %292 = vsinq.f32 %v225_v42 }
  0x61   :  { %v287_v44 = vpop.eup %286 }
  0x62   :  { %v289_v45 = vpop.eup %288  ;;  %v133_v46 = vxor.u32 2147483648, %v287_v44 }
  0x63   :  { %v130_v48 = vxor.u32 2147483648, %v289_v45 }
  0x64   :  { %v134_v7 = vsel %vm132_vm2, %v133_v46, %v289_v45 }
  0x65   :  { %v131_v49 = vsel %vm129_vm3, %v287_v44, %v130_v48 }
  0x66   :  { %v135_v50 = vsel %vm128_vm4, %v131_v49, %v134_v7 }
  0x67   :  { %v136_v51 = vsel %vm125_vm5, nan, %v135_v50 }
  0x68   :  { %241 = vst [vmem:[#allocation6] sm:$0xff] %v136_v51  ;;  %v291_v52 = vpop.eup %290 }
  0x69   :  { %v293_v53 = vpop.eup %292  ;;  %v237_v54 = vxor.u32 2147483648, %v291_v52 }
  0x6a   :  { %v234_v55 = vxor.u32 2147483648, %v293_v53 }
  0x6b   :  { %v238_v56 = vsel %vm236_vm6, %v237_v54, %v293_v53 }
  0x6c   :  { %v235_v57 = vsel %vm233_vm7, %v291_v52, %v234_v55 }
  0x6d   :  { %v239_v3 = vsel %vm232_vm8, %v235_v57, %v238_v56 }
  0x6e   :  { %v240_v58 = vsel %vm229_vm9, nan, %v239_v3 }
  0x6f   :  { %242 = vst [vmem:[#allocation6 + $0x8] sm:$0xff] %v240_v58 }
  0x70   :  { %327 = shalt.err (!%p324_p12)
}
  0x71   :  { %s328_s28 = scalar_lea.hbm %s472_s2, 256 }
  0x72   :  { %p329_p13 = scmp.ne.s32.totalorder %s472_s2, %s328_s28  ;;  %p332_p0 = scmp.lt.u32.totalorder %s328_s28, %s472_s2 }
  0x74   :  { %p334_p1 = pnand %p332_p0, %p329_p13 }
  0x76   :  { %337 = shalt.err (!%p334_p1)
}
  0x77   :  { %254 = dma.vmem_to_hbm [thread:$0]  %s249_s1, 256, %s472_s2, [#allocation5], %s343_s19, %s343_s19, %s344_s20  }
  0x78   :  { %340 = dma.done.wait [#allocation5], 256  }
  0x79   :  { %341 = vsyncadd [#allocation5], 4294967040 }
  0x7a   :  { %258 = vsyncpa [#allocation4], 1 }
  0x7b   :  { %259 = vsyncpa [#allocation5], 1 }

</bundles_post_ra>
